<compile_context>
chip_gen: v7x
topology: tpu7x:2x2x1
jax: 0.10.0
libtpu: 0.0.40
codegen_flags: <defaults>
</compile_context>

<pallas_src>
import math
from typing import NamedTuple

import jax
import jax.numpy as jnp
from jax import lax
from jax.experimental import pallas as pl
from jax.experimental.pallas import tpu as pltpu

LOG_2PI = 1.8378770664093453
INV_SQRT2 = 0.7071067811865476
INV_SQRT_2PI = 0.3989422804014327
NEG_INF = -1e8          # keep finite so masked probs*log_probs is exactly 0


def _agent_kernel(x_ref, m_ref, wc_ref, masks_ref, gumbel_ref, noise_ref,
                  scal_ref, vec_ref, vlp_ref):
    f32 = jnp.float32

    x = x_ref[...]                         # (TP, 4C) bf16: [scalars | vectors comp-major]
    fused = m_ref[...]                     # (4C, 4F) bf16: [logit cols | c0 | c1 | c2]
    TP = x.shape[0]
    C = x.shape[1] // 4
    F = masks_ref.shape[1]

    # ---- actor tensor product: ONE wide bf16 MXU matmul (K=4C, N=4F) --------
    out = jnp.dot(x, fused, preferred_element_type=f32)              # (TP, 4F)
    logits = out[:, 0 * F:1 * F]
    c0 = out[:, 1 * F:2 * F]
    c1 = out[:, 2 * F:3 * F]
    c2 = out[:, 3 * F:4 * F]

    # ---- critic: o3.Linear (0e -> 0e path) as a VPU reduce -------------------
    value = jnp.sum(x[:, :C].astype(f32) * wc_ref[...], axis=-1, keepdims=True)  # (TP,1)

    # ---- CategoricalMasked ----------------------------------------------------
    # Precondition: every (real) row has at least one unmasked action.
    keep = masks_ref[...] > 0
    masked_logits = jnp.where(keep, logits, f32(NEG_INF))
    m = jnp.max(masked_logits, axis=-1, keepdims=True)
    shifted = masked_logits - m
    e = jnp.exp(shifted)
    sum_e = jnp.sum(e, axis=-1, keepdims=True)
    log_probs = shifted - jnp.log(sum_e)
    # approx EUP reciprocal: ~1e-3-level relative error on entropy only (fine for RL).
    probs = e * pl.reciprocal(sum_e, approx=True)

    gumbel = gumbel_ref[...]                                          # (TP, F) f32
    score = masked_logits + gumbel
    row_max = jnp.max(score, axis=-1, keepdims=True)
    col = lax.broadcasted_iota(jnp.int32, (TP, F), 1)
    cand = jnp.where(score == row_max, col, jnp.int32(F))
    frag_i = jnp.min(cand, axis=-1, keepdims=True)                    # (TP,1) int32
    onehot = col == frag_i
    frag_logprob = jnp.sum(jnp.where(onehot, log_probs, 0.0), axis=-1, keepdims=True)
    p_log_p = jnp.where(keep, log_probs * probs, 0.0)
    frag_entropy = -jnp.sum(p_log_p, axis=-1, keepdims=True)

    # ---- ProjectedNormal: sample + 3-D log_prob -------------------------------
    noise = noise_ref[...]                                            # (TP, 3F) f32
    n0, n1, n2 = noise[:, :F], noise[:, F:2 * F], noise[:, 2 * F:]
    r0, r1, r2 = c0 + n0, c1 + n1, c2 + n2
    inv = lax.rsqrt(jnp.maximum(r0 * r0 + r1 * r1 + r2 * r2, f32(1e-20)))
    u0, u1, u2 = r0 * inv, r1 * inv, r2 * inv                         # unit vectors

    t = c0 * u0 + c1 * u1 + c2 * u2
    t2 = t * t
    cc = c0 * c0 + c1 * c1 + c2 * c2
    perp_part = -0.5 * (cc - t2) - f32(LOG_2PI)

    # Phi(t) via A&S 7.1.26 erfc form; exp(-t^2/2) shared with the pdf term.
    eneg = jnp.exp(-0.5 * t2)
    ax = jnp.abs(t) * f32(INV_SQRT2)
    k1 = 1.0 / (1.0 + 0.3275911 * ax)
    poly = ((((1.061405429 * k1 - 1.453152027) * k1 + 1.421413741) * k1
             - 0.284496736) * k1 + 0.254829592) * k1
    erfc_ax = poly * eneg                                             # erfc(|t|/sqrt2)
    ndtr = jnp.where(t >= 0.0, 1.0 - 0.5 * erfc_ax, 0.5 * erfc_ax)

    arg_direct = t * f32(INV_SQRT_2PI) * eneg + (1.0 + t2) * ndtr
    # Cancellation-free asymptotic for strongly negative t:
    #   arg ~= phi(|t|) * (2/|t|^3) * (1 - 6/t^2 + 45/t^4)
    at = jnp.maximum(-t, 1.0)
    inv_at = pl.reciprocal(at, approx=True)       # feeds a clamped correction only
    it2 = inv_at * inv_at
    corr = jnp.maximum(1.0 - 6.0 * it2 + 45.0 * it2 * it2, f32(0.04))
    arg_asym = 2.0 * corr * it2 * inv_at
    use_asym = t < -4.0
    # single EUP log across both branches; gaussian offset added under predicate.
    log_arg = jnp.log(jnp.maximum(jnp.where(use_asym, arg_asym, arg_direct), f32(1e-30)))
    para_part = jnp.where(use_asym, log_arg - 0.5 * t2 - f32(0.5 * LOG_2PI), log_arg)

    # ---- writes (lane-dense) ---------------------------------------------------
    lane = lax.broadcasted_iota(jnp.int32, (TP, 128), 1)
    packed = (jnp.where(lane == 0, frag_i.astype(f32), 0.0)
              + jnp.where(lane == 1, frag_logprob, 0.0)
              + jnp.where(lane == 2, frag_entropy, 0.0)
              + jnp.where(lane == 3, value, 0.0))
    scal_ref[...] = packed                                            # (TP, 128)
    vec_ref[:, 0 * F:1 * F] = u0                                      # static, lane-aligned
    vec_ref[:, 1 * F:2 * F] = u1
    vec_ref[:, 2 * F:3 * F] = u2
    vlp_ref[...] = para_part + perp_part                              # (TP, F)


class Action(NamedTuple):
    frag_i: jax.Array
    frag_logprob: jax.Array
    frag_entropy: jax.Array
    vector: jax.Array
    vector_logprob: jax.Array


def _round_up(n: int, m: int) -> int:
    return ((n + m - 1) // m) * m


def agent_forward(features, fragment_features, masks, params, gumbel, noise):
    """features: (P, 4C), fragment_features: (F, 4C), masks: (P, F) {0,1},
    gumbel: (P, F), noise: (3, P, F)."""
    P, D = features.shape
    F = fragment_features.shape[0]
    C = D // 4
    f32 = jnp.float32
    bf16 = jnp.bfloat16

    w0, w1, w2, w3, wc = params
    alpha = 1.0 / math.sqrt(2.0 * C * C)        # per-output-irrep path normalization
    inv_sqrt3 = 1.0 / math.sqrt(3.0)            # CG factor for 1o x 1o -> 0e

    def split_irreps(x):
        xs = x[:, :C]                                          # (N, C) scalars
        xv = x[:, C:].reshape(x.shape[0], C, 3)                # e3nn channel-major
        xv_cm = jnp.transpose(xv, (0, 2, 1)).reshape(x.shape[0], 3 * C)
        return xs, xv_cm                                       # (N, C), (N, 3C)

    xs_p, xv_p = split_irreps(features.astype(f32))
    xs_f, xv_f = split_irreps(fragment_features.astype(f32))
    x_all = jnp.concatenate([xs_p, xv_p], axis=1)              # (P, 4C)

    # Fragment-side operands (per-component, transposed).
    z_s = xs_f.T                                               # (C, F)
    z_vk = [xv_f[:, k * C:(k + 1) * C].T for k in range(3)]    # 3 x (C, F)

    # Algebraic fusion of the two-stage tensor product: (x @ W) @ Z == x @ (W @ Z).
    # Column blocks: [logits (F) | c0 (F) | c1 (F) | c2 (F)]; rows indexed by
    # [scalars (C) | vec comp0 (C) | vec comp1 (C) | vec comp2 (C)].
    w0z = alpha * (w0 @ z_s)                                                       # (C, F)
    w1z = jnp.concatenate([(alpha * inv_sqrt3) * (w1 @ z) for z in z_vk], axis=0)  # (3C, F)
    w2z = alpha * jnp.concatenate([w2 @ z for z in z_vk], axis=1)                  # (C, 3F)
    w3z = alpha * (w3 @ z_s)                                                       # (C, F)
    a_cols = jnp.concatenate([w0z, w1z], axis=0)                                   # (4C, F)
    b_cols = jnp.concatenate([w2z, jnp.kron(jnp.eye(3, dtype=f32), w3z)], axis=0)  # (4C, 3F)
    fused = jnp.concatenate([a_cols, b_cols], axis=1).astype(bf16)                 # (4C, 4F)

    wc_row = (wc[:, 0] * (1.0 / math.sqrt(C))).reshape(1, C).astype(f32)

    noise_cm = jnp.concatenate([noise[0], noise[1], noise[2]], axis=1)             # (P, 3F)

    # ---- P tiling: multiple of 16 (bf16 sublane pack), >=2 grid steps when
    # P >= 32 (v7x has 2 TensorCores), tiles capped at 512 rows (comfortably
    # under v7x's 64 MiB VMEM even double-buffered).  P is padded to a tile
    # multiple with benign zero rows and outputs are sliced back.
    P16 = _round_up(P, 16)
    if P16 <= 32:
        TP = P16
    else:
        TP = min(512, _round_up((P16 + 1) // 2, 16))
    P_pad = _round_up(P16, TP)
    grid = (P_pad // TP,)

    def pad_rows(a):
        if a.shape[0] == P_pad:
            return a
        return jnp.pad(a, ((0, P_pad - a.shape[0]), (0, 0)))

    x_b = pad_rows(x_all).astype(bf16)                  # bf16 MXU operand
    masks_b = pad_rows(masks.astype(bf16))              # bf16: halve mask traffic
    gumbel_f = pad_rows(gumbel.astype(f32))             # f32: Gumbel-max sample parity
    noise_f = pad_rows(noise_cm.astype(f32))            # f32: ProjectedNormal sample parity

    def row_spec(w):
        return pl.BlockSpec((TP, w), lambda i: (i, 0))

    def full_spec(shape):
        return pl.BlockSpec(shape, lambda i: (0,) * len(shape))

    in_specs = [
        row_spec(4 * C),                 # x (pocket irreps, comp-major)
        full_spec((4 * C, 4 * F)),       # fused actor operand (grid-invariant)
        full_spec((1, C)),               # critic row
        row_spec(F),                     # masks
        row_spec(F),                     # gumbel
        row_spec(3 * F),                 # noise
    ]
    out_specs = (row_spec(128), row_spec(3 * F), row_spec(F))
    out_shape = (jax.ShapeDtypeStruct((P_pad, 128), f32),     # frag_i/logprob/entropy/value
                 jax.ShapeDtypeStruct((P_pad, 3 * F), f32),   # unit vectors, component-major
                 jax.ShapeDtypeStruct((P_pad, F), f32))       # vector_logprob

    packed, vec_cm, vec_lp = pl.pallas_call(
        _agent_kernel,
        grid=grid,
        in_specs=in_specs,
        out_specs=out_specs,
        out_shape=out_shape,
        compiler_params=pltpu.CompilerParams(
            dimension_semantics=("parallel",),
            vmem_limit_bytes=48 * 1024 * 1024),
    )(x_b, fused, wc_row, masks_b, gumbel_f, noise_f)

    frag_i = packed[:P, 0].astype(jnp.int32)
    frag_logprob = packed[:P, 1]
    frag_entropy = packed[:P, 2]
    value = packed[:P, 3:4]
    # TODO(synk): downstream consumers could take the lane-dense (P, 3, F) layout
    # directly and skip this minor-dim-3 relayout; kept for PyTorch (P, F, 3) parity.
    vector = jnp.transpose(vec_cm[:P].reshape(P, 3, F), (0, 2, 1))
    vec_lp = vec_lp[:P]

    action = Action(frag_i, frag_logprob, frag_entropy, vector, vec_lp)
    return action, value                                   # value: (P, 1)


if __name__ == "__main__":
    P, F, C = 8, 128, 32        # pockets, protected fragments (action_dim), irreps multiplicity
    D = 4 * C                   # "Cx0e + Cx1o" -> C + 3C

    key = jax.random.PRNGKey(0)
    ks = jax.random.split(key, 10)

    features = jax.random.normal(ks[0], (P, D), jnp.float32)
    fragment_features = jax.random.normal(ks[1], (F, D), jnp.float32)

    w0 = jax.random.normal(ks[2], (C, C), jnp.float32)
    w1 = jax.random.normal(ks[3], (C, C), jnp.float32)
    w2 = jax.random.normal(ks[4], (C, C), jnp.float32)
    w3 = jax.random.normal(ks[5], (C, C), jnp.float32)
    wc = jax.random.normal(ks[6], (C, 1), jnp.float32)
    params = (w0, w1, w2, w3, wc)

    masks = (jax.random.uniform(ks[7], (P, F)) > 0.3).astype(jnp.float32)
    masks = masks.at[:, 0].set(1.0)   # guarantee at least one valid action per pocket

    u = jax.random.uniform(ks[8], (P, F), minval=1e-6, maxval=1.0 - 1e-6)
    gumbel = -jnp.log(-jnp.log(u)).astype(jnp.float32)
    noise = jax.random.normal(ks[9], (3, P, F), jnp.float32)

    action, value = agent_forward(features, fragment_features, masks, params, gumbel, noise)
    jax.block_until_ready((action, value))

    frag_i, frag_lp, frag_ent, vector, vector_lp = action
    assert frag_i.shape == (P,) and frag_lp.shape == (P,) and frag_ent.shape == (P,)
    assert vector.shape == (P, F, 3) and vector_lp.shape == (P, F)
    assert value.shape == (P, 1)
    assert bool(jnp.all(jnp.isfinite(frag_lp)))
    assert bool(jnp.all(jnp.isfinite(frag_ent)))
    assert bool(jnp.all(jnp.isfinite(vector_lp)))
    assert bool(jnp.all(jnp.isfinite(value)))
    assert bool(jnp.all((frag_i >= 0) & (frag_i < F)))
    # sampled fragment indices respect the mask
    assert bool(jnp.all(masks[jnp.arange(P), frag_i] > 0))
    # sampled vectors are unit norm
    assert bool(jnp.allclose(jnp.linalg.norm(vector, axis=-1), 1.0, atol=1e-3))

    print("KERNEL_OK")
</pallas_src>

<mosaic_0001>
module attributes {stable_mosaic.version = 11 : i64} {
  func.func @_agent_kernel(%arg0: i32, %arg1: memref<16x128xbf16, #tpu.memory_space<vmem>>, %arg2: memref<128x512xbf16, #tpu.memory_space<vmem>>, %arg3: memref<1x32xf32, #tpu.memory_space<vmem>>, %arg4: memref<16x128xbf16, #tpu.memory_space<vmem>>, %arg5: memref<16x128xf32, #tpu.memory_space<vmem>>, %arg6: memref<16x384xf32, #tpu.memory_space<vmem>>, %arg7: memref<16x128xf32, #tpu.memory_space<vmem>>, %arg8: memref<16x384xf32, #tpu.memory_space<vmem>>, %arg9: memref<16x128xf32, #tpu.memory_space<vmem>>) attributes {dimension_semantics = [#tpu.dimension_semantics<parallel>], iteration_bounds = array<i64: 1>, scalar_prefetch = 0 : i64, scratch_operands = 0 : i64, tpu.core_type = #tpu.core_type<tc>, window_params = [{transform_indices = @transform_0, window_bounds = array<i64: 16, 128>}, {pipeline_mode = #tpu.pipeline_mode<synchronous>, transform_indices = @transform_1, window_bounds = array<i64: 128, 512>}, {pipeline_mode = #tpu.pipeline_mode<synchronous>, transform_indices = @transform_2, window_bounds = array<i64: 1, 32>}, {transform_indices = @transform_3, window_bounds = array<i64: 16, 128>}, {transform_indices = @transform_4, window_bounds = array<i64: 16, 128>}, {transform_indices = @transform_5, window_bounds = array<i64: 16, 384>}, {transform_indices = @transform_6, window_bounds = array<i64: 16, 128>}, {transform_indices = @transform_7, window_bounds = array<i64: 16, 384>}, {transform_indices = @transform_8, window_bounds = array<i64: 16, 128>}]} {
    %c0 = arith.constant 0 : index
    %c0_0 = arith.constant 0 : index
    %0 = vector.load %arg1[%c0, %c0_0] : memref<16x128xbf16, #tpu.memory_space<vmem>>, vector<16x128xbf16>
    %c0_1 = arith.constant 0 : index
    %c0_2 = arith.constant 0 : index
    %1 = vector.load %arg2[%c0_1, %c0_2] : memref<128x512xbf16, #tpu.memory_space<vmem>>, vector<128x512xbf16>
    %cst = arith.constant dense<0.000000e+00> : vector<16x512xf32>
    %2 = tpu.matmul %0, %1, %cst {dimension_numbers = #tpu.dot_dimension_numbers<[1], [0], [0], [1], [0, 0, 1, 1], [], []>} : vector<16x128xbf16>, vector<128x512xbf16>, vector<16x512xf32> -> vector<16x512xf32>
    %3 = vector.extract_strided_slice %2 {offsets = [0, 0], sizes = [16, 128], strides = [1, 1]} : vector<16x512xf32> to vector<16x128xf32>
    %4 = vector.extract_strided_slice %2 {offsets = [0, 128], sizes = [16, 128], strides = [1, 1]} : vector<16x512xf32> to vector<16x128xf32>
    %5 = vector.extract_strided_slice %2 {offsets = [0, 256], sizes = [16, 128], strides = [1, 1]} : vector<16x512xf32> to vector<16x128xf32>
    %6 = vector.extract_strided_slice %2 {offsets = [0, 384], sizes = [16, 128], strides = [1, 1]} : vector<16x512xf32> to vector<16x128xf32>
    %7 = vector.extract_strided_slice %0 {offsets = [0, 0], sizes = [16, 32], strides = [1, 1]} : vector<16x128xbf16> to vector<16x32xbf16>
    %8 = arith.extf %7 : vector<16x32xbf16> to vector<16x32xf32>
    %c0_3 = arith.constant 0 : index
    %c0_4 = arith.constant 0 : index
    %9 = vector.load %arg3[%c0_3, %c0_4] : memref<1x32xf32, #tpu.memory_space<vmem>>, vector<1x32xf32>
    %10 = vector.broadcast %9 : vector<1x32xf32> to vector<16x32xf32>
    %11 = arith.mulf %8, %10 : vector<16x32xf32>
    %cst_5 = arith.constant dense<0.000000e+00> : vector<16xf32>
    %12 = vector.multi_reduction <add>, %11, %cst_5 [1] : vector<16x32xf32> to vector<16xf32>
    %13 = vector.shape_cast %12 : vector<16xf32> to vector<16x1xf32>
    %c0_6 = arith.constant 0 : index
    %c0_7 = arith.constant 0 : index
    %14 = vector.load %arg4[%c0_6, %c0_7] : memref<16x128xbf16, #tpu.memory_space<vmem>>, vector<16x128xbf16>
    %cst_8 = arith.constant 0.000000e+00 : bf16
    %15 = vector.broadcast %cst_8 : bf16 to vector<16x128xbf16>
    %16 = arith.cmpf ogt, %14, %15 : vector<16x128xbf16>
    %cst_9 = arith.constant -1.000000e+08 : f32
    %17 = vector.broadcast %cst_9 : f32 to vector<16x128xf32>
    %18 = arith.select %16, %3, %17 : vector<16x128xi1>, vector<16x128xf32>
    %cst_10 = arith.constant dense<0xFF800000> : vector<16xf32>
    %19 = vector.multi_reduction <maximumf>, %18, %cst_10 [1] : vector<16x128xf32> to vector<16xf32>
    %20 = vector.shape_cast %19 : vector<16xf32> to vector<16x1xf32>
    %21 = vector.broadcast %20 : vector<16x1xf32> to vector<16x128xf32>
    %22 = arith.subf %18, %21 : vector<16x128xf32>
    %23 = math.exp %22 : vector<16x128xf32>
    %cst_11 = arith.constant dense<0.000000e+00> : vector<16xf32>
    %24 = vector.multi_reduction <add>, %23, %cst_11 [1] : vector<16x128xf32> to vector<16xf32>
    %25 = vector.shape_cast %24 : vector<16xf32> to vector<16x1xf32>
    %26 = math.log %25 : vector<16x1xf32>
    %27 = vector.broadcast %26 : vector<16x1xf32> to vector<16x128xf32>
    %28 = arith.subf %22, %27 : vector<16x128xf32>
    %29 = tpu.reciprocal %25 {approx = true} : vector<16x1xf32> -> vector<16x1xf32>
    %30 = vector.broadcast %29 : vector<16x1xf32> to vector<16x128xf32>
    %31 = arith.mulf %23, %30 : vector<16x128xf32>
    %c0_12 = arith.constant 0 : index
    %c0_13 = arith.constant 0 : index
    %32 = vector.load %arg5[%c0_12, %c0_13] : memref<16x128xf32, #tpu.memory_space<vmem>>, vector<16x128xf32>
    %33 = arith.addf %18, %32 : vector<16x128xf32>
    %cst_14 = arith.constant dense<0xFF800000> : vector<16xf32>
    %34 = vector.multi_reduction <maximumf>, %33, %cst_14 [1] : vector<16x128xf32> to vector<16xf32>
    %35 = vector.shape_cast %34 : vector<16xf32> to vector<16x1xf32>
    %36 = tpu.iota {dimensions = array<i32: 1>} : vector<16x128xi32>
    %37 = vector.broadcast %35 : vector<16x1xf32> to vector<16x128xf32>
    %38 = arith.cmpf oeq, %33, %37 : vector<16x128xf32>
    %c128_i32 = arith.constant 128 : i32
    %39 = vector.broadcast %c128_i32 : i32 to vector<16x128xi32>
    %40 = arith.select %38, %36, %39 : vector<16x128xi1>, vector<16x128xi32>
    %cst_15 = arith.constant dense<2147483647> : vector<16xi32>
    %41 = vector.multi_reduction <minsi>, %40, %cst_15 [1] : vector<16x128xi32> to vector<16xi32>
    %42 = vector.shape_cast %41 : vector<16xi32> to vector<16x1xi32>
    %43 = vector.broadcast %42 : vector<16x1xi32> to vector<16x128xi32>
    %44 = arith.cmpi eq, %36, %43 : vector<16x128xi32>
    %cst_16 = arith.constant 0.000000e+00 : f32
    %45 = vector.broadcast %cst_16 : f32 to vector<16x128xf32>
    %46 = arith.select %44, %28, %45 : vector<16x128xi1>, vector<16x128xf32>
    %cst_17 = arith.constant dense<0.000000e+00> : vector<16xf32>
    %47 = vector.multi_reduction <add>, %46, %cst_17 [1] : vector<16x128xf32> to vector<16xf32>
    %48 = vector.shape_cast %47 : vector<16xf32> to vector<16x1xf32>
    %49 = arith.mulf %28, %31 : vector<16x128xf32>
    %cst_18 = arith.constant 0.000000e+00 : f32
    %50 = vector.broadcast %cst_18 : f32 to vector<16x128xf32>
    %51 = arith.select %16, %49, %50 : vector<16x128xi1>, vector<16x128xf32>
    %cst_19 = arith.constant dense<0.000000e+00> : vector<16xf32>
    %52 = vector.multi_reduction <add>, %51, %cst_19 [1] : vector<16x128xf32> to vector<16xf32>
    %53 = vector.shape_cast %52 : vector<16xf32> to vector<16x1xf32>
    %cst_20 = arith.constant 0.000000e+00 : f32
    %54 = vector.broadcast %cst_20 : f32 to vector<16x1xf32>
    %55 = arith.subf %54, %53 : vector<16x1xf32>
    %c0_21 = arith.constant 0 : index
    %c0_22 = arith.constant 0 : index
    %56 = vector.load %arg6[%c0_21, %c0_22] : memref<16x384xf32, #tpu.memory_space<vmem>>, vector<16x384xf32>
    %57 = vector.extract_strided_slice %56 {offsets = [0, 0], sizes = [16, 128], strides = [1, 1]} : vector<16x384xf32> to vector<16x128xf32>
    %58 = vector.extract_strided_slice %56 {offsets = [0, 128], sizes = [16, 128], strides = [1, 1]} : vector<16x384xf32> to vector<16x128xf32>
    %59 = vector.extract_strided_slice %56 {offsets = [0, 256], sizes = [16, 128], strides = [1, 1]} : vector<16x384xf32> to vector<16x128xf32>
    %60 = arith.addf %4, %57 : vector<16x128xf32>
    %61 = arith.addf %5, %58 : vector<16x128xf32>
    %62 = arith.addf %6, %59 : vector<16x128xf32>
    %63 = arith.mulf %60, %60 : vector<16x128xf32>
    %64 = arith.mulf %61, %61 : vector<16x128xf32>
    %65 = arith.addf %63, %64 : vector<16x128xf32>
    %66 = arith.mulf %62, %62 : vector<16x128xf32>
    %67 = arith.addf %65, %66 : vector<16x128xf32>
    %cst_23 = arith.constant 9.99999968E-21 : f32
    %68 = vector.broadcast %cst_23 : f32 to vector<16x128xf32>
    %69 = arith.maximumf %67, %68 : vector<16x128xf32>
    %70 = math.rsqrt %69 : vector<16x128xf32>
    %71 = arith.mulf %60, %70 : vector<16x128xf32>
    %72 = arith.mulf %61, %70 : vector<16x128xf32>
    %73 = arith.mulf %62, %70 : vector<16x128xf32>
    %74 = arith.mulf %4, %71 : vector<16x128xf32>
    %75 = arith.mulf %5, %72 : vector<16x128xf32>
    %76 = arith.addf %74, %75 : vector<16x128xf32>
    %77 = arith.mulf %6, %73 : vector<16x128xf32>
    %78 = arith.addf %76, %77 : vector<16x128xf32>
    %79 = arith.mulf %78, %78 : vector<16x128xf32>
    %80 = arith.mulf %4, %4 : vector<16x128xf32>
    %81 = arith.mulf %5, %5 : vector<16x128xf32>
    %82 = arith.addf %80, %81 : vector<16x128xf32>
    %83 = arith.mulf %6, %6 : vector<16x128xf32>
    %84 = arith.addf %82, %83 : vector<16x128xf32>
    %85 = arith.subf %84, %79 : vector<16x128xf32>
    %cst_24 = arith.constant -5.000000e-01 : f32
    %86 = vector.broadcast %cst_24 : f32 to vector<16x128xf32>
    %87 = arith.mulf %86, %85 : vector<16x128xf32>
    %cst_25 = arith.constant 1.83787704 : f32
    %88 = vector.broadcast %cst_25 : f32 to vector<16x128xf32>
    %89 = arith.subf %87, %88 : vector<16x128xf32>
    %cst_26 = arith.constant -5.000000e-01 : f32
    %90 = vector.broadcast %cst_26 : f32 to vector<16x128xf32>
    %91 = arith.mulf %90, %79 : vector<16x128xf32>
    %92 = math.exp %91 : vector<16x128xf32>
    %93 = math.absf %78 : vector<16x128xf32>
    %cst_27 = arith.constant 0.707106769 : f32
    %94 = vector.broadcast %cst_27 : f32 to vector<16x128xf32>
    %95 = arith.mulf %93, %94 : vector<16x128xf32>
    %cst_28 = arith.constant 0.327591091 : f32
    %96 = vector.broadcast %cst_28 : f32 to vector<16x128xf32>
    %97 = arith.mulf %96, %95 : vector<16x128xf32>
    %cst_29 = arith.constant 1.000000e+00 : f32
    %98 = vector.broadcast %cst_29 : f32 to vector<16x128xf32>
    %99 = arith.addf %98, %97 : vector<16x128xf32>
    %cst_30 = arith.constant 1.000000e+00 : f32
    %100 = vector.broadcast %cst_30 : f32 to vector<16x128xf32>
    %101 = arith.divf %100, %99 : vector<16x128xf32>
    %cst_31 = arith.constant 1.06140542 : f32
    %102 = vector.broadcast %cst_31 : f32 to vector<16x128xf32>
    %103 = arith.mulf %102, %101 : vector<16x128xf32>
    %cst_32 = arith.constant 1.45315206 : f32
    %104 = vector.broadcast %cst_32 : f32 to vector<16x128xf32>
    %105 = arith.subf %103, %104 : vector<16x128xf32>
    %106 = arith.mulf %105, %101 : vector<16x128xf32>
    %cst_33 = arith.constant 1.42141378 : f32
    %107 = vector.broadcast %cst_33 : f32 to vector<16x128xf32>
    %108 = arith.addf %106, %107 : vector<16x128xf32>
    %109 = arith.mulf %108, %101 : vector<16x128xf32>
    %cst_34 = arith.constant 0.284496725 : f32
    %110 = vector.broadcast %cst_34 : f32 to vector<16x128xf32>
    %111 = arith.subf %109, %110 : vector<16x128xf32>
    %112 = arith.mulf %111, %101 : vector<16x128xf32>
    %cst_35 = arith.constant 0.254829586 : f32
    %113 = vector.broadcast %cst_35 : f32 to vector<16x128xf32>
    %114 = arith.addf %112, %113 : vector<16x128xf32>
    %115 = arith.mulf %114, %101 : vector<16x128xf32>
    %116 = arith.mulf %115, %92 : vector<16x128xf32>
    %cst_36 = arith.constant 0.000000e+00 : f32
    %117 = vector.broadcast %cst_36 : f32 to vector<16x128xf32>
    %118 = arith.cmpf oge, %78, %117 : vector<16x128xf32>
    %cst_37 = arith.constant 5.000000e-01 : f32
    %119 = vector.broadcast %cst_37 : f32 to vector<16x128xf32>
    %120 = arith.mulf %119, %116 : vector<16x128xf32>
    %cst_38 = arith.constant 1.000000e+00 : f32
    %121 = vector.broadcast %cst_38 : f32 to vector<16x128xf32>
    %122 = arith.subf %121, %120 : vector<16x128xf32>
    %cst_39 = arith.constant 5.000000e-01 : f32
    %123 = vector.broadcast %cst_39 : f32 to vector<16x128xf32>
    %124 = arith.mulf %123, %116 : vector<16x128xf32>
    %125 = arith.select %118, %122, %124 : vector<16x128xi1>, vector<16x128xf32>
    %cst_40 = arith.constant 0.398942292 : f32
    %126 = vector.broadcast %cst_40 : f32 to vector<16x128xf32>
    %127 = arith.mulf %78, %126 : vector<16x128xf32>
    %128 = arith.mulf %127, %92 : vector<16x128xf32>
    %cst_41 = arith.constant 1.000000e+00 : f32
    %129 = vector.broadcast %cst_41 : f32 to vector<16x128xf32>
    %130 = arith.addf %129, %79 : vector<16x128xf32>
    %131 = arith.mulf %130, %125 : vector<16x128xf32>
    %132 = arith.addf %128, %131 : vector<16x128xf32>
    %cst_42 = arith.constant 0.000000e+00 : f32
    %133 = vector.broadcast %cst_42 : f32 to vector<16x128xf32>
    %134 = arith.subf %133, %78 : vector<16x128xf32>
    %cst_43 = arith.constant 1.000000e+00 : f32
    %135 = vector.broadcast %cst_43 : f32 to vector<16x128xf32>
    %136 = arith.maximumf %134, %135 : vector<16x128xf32>
    %137 = tpu.reciprocal %136 {approx = true} : vector<16x128xf32> -> vector<16x128xf32>
    %138 = arith.mulf %137, %137 : vector<16x128xf32>
    %cst_44 = arith.constant 6.000000e+00 : f32
    %139 = vector.broadcast %cst_44 : f32 to vector<16x128xf32>
    %140 = arith.mulf %139, %138 : vector<16x128xf32>
    %cst_45 = arith.constant 1.000000e+00 : f32
    %141 = vector.broadcast %cst_45 : f32 to vector<16x128xf32>
    %142 = arith.subf %141, %140 : vector<16x128xf32>
    %cst_46 = arith.constant 4.500000e+01 : f32
    %143 = vector.broadcast %cst_46 : f32 to vector<16x128xf32>
    %144 = arith.mulf %143, %138 : vector<16x128xf32>
    %145 = arith.mulf %144, %138 : vector<16x128xf32>
    %146 = arith.addf %142, %145 : vector<16x128xf32>
    %cst_47 = arith.constant 4.000000e-02 : f32
    %147 = vector.broadcast %cst_47 : f32 to vector<16x128xf32>
    %148 = arith.maximumf %146, %147 : vector<16x128xf32>
    %cst_48 = arith.constant 2.000000e+00 : f32
    %149 = vector.broadcast %cst_48 : f32 to vector<16x128xf32>
    %150 = arith.mulf %149, %148 : vector<16x128xf32>
    %151 = arith.mulf %150, %138 : vector<16x128xf32>
    %152 = arith.mulf %151, %137 : vector<16x128xf32>
    %cst_49 = arith.constant -4.000000e+00 : f32
    %153 = vector.broadcast %cst_49 : f32 to vector<16x128xf32>
    %154 = arith.cmpf olt, %78, %153 : vector<16x128xf32>
    %155 = arith.select %154, %152, %132 : vector<16x128xi1>, vector<16x128xf32>
    %cst_50 = arith.constant 1.000000e-30 : f32
    %156 = vector.broadcast %cst_50 : f32 to vector<16x128xf32>
    %157 = arith.maximumf %155, %156 : vector<16x128xf32>
    %158 = math.log %157 : vector<16x128xf32>
    %cst_51 = arith.constant 5.000000e-01 : f32
    %159 = vector.broadcast %cst_51 : f32 to vector<16x128xf32>
    %160 = arith.mulf %159, %79 : vector<16x128xf32>
    %161 = arith.subf %158, %160 : vector<16x128xf32>
    %cst_52 = arith.constant 0.918938517 : f32
    %162 = vector.broadcast %cst_52 : f32 to vector<16x128xf32>
    %163 = arith.subf %161, %162 : vector<16x128xf32>
    %164 = arith.select %154, %163, %158 : vector<16x128xi1>, vector<16x128xf32>
    %165 = tpu.iota {dimensions = array<i32: 1>} : vector<16x128xi32>
    %c0_i32 = arith.constant 0 : i32
    %166 = vector.broadcast %c0_i32 : i32 to vector<16x128xi32>
    %167 = arith.cmpi eq, %165, %166 : vector<16x128xi32>
    %168 = arith.sitofp %42 : vector<16x1xi32> to vector<16x1xf32>
    %cst_53 = arith.constant 0.000000e+00 : f32
    %169 = vector.shape_cast %168 : vector<16x1xf32> to vector<16x1xf32>
    %170 = vector.broadcast %169 : vector<16x1xf32> to vector<16x128xf32>
    %171 = vector.broadcast %cst_53 : f32 to vector<16x128xf32>
    %172 = arith.select %167, %170, %171 : vector<16x128xi1>, vector<16x128xf32>
    %c1_i32 = arith.constant 1 : i32
    %173 = vector.broadcast %c1_i32 : i32 to vector<16x128xi32>
    %174 = arith.cmpi eq, %165, %173 : vector<16x128xi32>
    %cst_54 = arith.constant 0.000000e+00 : f32
    %175 = vector.shape_cast %48 : vector<16x1xf32> to vector<16x1xf32>
    %176 = vector.broadcast %175 : vector<16x1xf32> to vector<16x128xf32>
    %177 = vector.broadcast %cst_54 : f32 to vector<16x128xf32>
    %178 = arith.select %174, %176, %177 : vector<16x128xi1>, vector<16x128xf32>
    %179 = arith.addf %172, %178 : vector<16x128xf32>
    %c2_i32 = arith.constant 2 : i32
    %180 = vector.broadcast %c2_i32 : i32 to vector<16x128xi32>
    %181 = arith.cmpi eq, %165, %180 : vector<16x128xi32>
    %cst_55 = arith.constant 0.000000e+00 : f32
    %182 = vector.shape_cast %55 : vector<16x1xf32> to vector<16x1xf32>
    %183 = vector.broadcast %182 : vector<16x1xf32> to vector<16x128xf32>
    %184 = vector.broadcast %cst_55 : f32 to vector<16x128xf32>
    %185 = arith.select %181, %183, %184 : vector<16x128xi1>, vector<16x128xf32>
    %186 = arith.addf %179, %185 : vector<16x128xf32>
    %c3_i32 = arith.constant 3 : i32
    %187 = vector.broadcast %c3_i32 : i32 to vector<16x128xi32>
    %188 = arith.cmpi eq, %165, %187 : vector<16x128xi32>
    %cst_56 = arith.constant 0.000000e+00 : f32
    %189 = vector.shape_cast %13 : vector<16x1xf32> to vector<16x1xf32>
    %190 = vector.broadcast %189 : vector<16x1xf32> to vector<16x128xf32>
    %191 = vector.broadcast %cst_56 : f32 to vector<16x128xf32>
    %192 = arith.select %188, %190, %191 : vector<16x128xi1>, vector<16x128xf32>
    %193 = arith.addf %186, %192 : vector<16x128xf32>
    %c0_57 = arith.constant 0 : index
    %c0_58 = arith.constant 0 : index
    %194 = vector.load %arg7[%c0_57, %c0_58] : memref<16x128xf32, #tpu.memory_space<vmem>>, vector<16x128xf32>
    tpu.vector_store %arg7[%c0_57, %c0_58], %193 {strides = array<i32>} : memref<16x128xf32, #tpu.memory_space<vmem>>, vector<16x128xf32>,
    %c0_59 = arith.constant 0 : index
    %c0_60 = arith.constant 0 : index
    %195 = vector.load %arg8[%c0_59, %c0_60] : memref<16x384xf32, #tpu.memory_space<vmem>>, vector<16x128xf32>
    tpu.vector_store %arg8[%c0_59, %c0_60], %71 {strides = array<i32>} : memref<16x384xf32, #tpu.memory_space<vmem>>, vector<16x128xf32>,
    %c0_61 = arith.constant 0 : index
    %c128 = arith.constant 128 : index
    %196 = vector.load %arg8[%c0_61, %c128] : memref<16x384xf32, #tpu.memory_space<vmem>>, vector<16x128xf32>
    tpu.vector_store %arg8[%c0_61, %c128], %72 {strides = array<i32>} : memref<16x384xf32, #tpu.memory_space<vmem>>, vector<16x128xf32>,
    %c0_62 = arith.constant 0 : index
    %c256 = arith.constant 256 : index
    %197 = vector.load %arg8[%c0_62, %c256] : memref<16x384xf32, #tpu.memory_space<vmem>>, vector<16x128xf32>
    tpu.vector_store %arg8[%c0_62, %c256], %73 {strides = array<i32>} : memref<16x384xf32, #tpu.memory_space<vmem>>, vector<16x128xf32>,
    %198 = arith.addf %164, %89 : vector<16x128xf32>
    %c0_63 = arith.constant 0 : index
    %c0_64 = arith.constant 0 : index
    %199 = vector.load %arg9[%c0_63, %c0_64] : memref<16x128xf32, #tpu.memory_space<vmem>>, vector<16x128xf32>
    tpu.vector_store %arg9[%c0_63, %c0_64], %198 {strides = array<i32>} : memref<16x128xf32, #tpu.memory_space<vmem>>, vector<16x128xf32>,
    return
  }
  func.func @transform_0(%arg0: i32) -> (i32, i32) {
    %c0_i32 = arith.constant 0 : i32
    %c0_i32_0 = arith.constant 0 : i32
    return %arg0, %c0_i32 : i32, i32
  }
  func.func @transform_1(%arg0: i32) -> (i32, i32) {
    %c0_i32 = arith.constant 0 : i32
    %c0_i32_0 = arith.constant 0 : i32
    %c0_i32_1 = arith.constant 0 : i32
    return %c0_i32, %c0_i32_0 : i32, i32
  }
  func.func @transform_2(%arg0: i32) -> (i32, i32) {
    %c0_i32 = arith.constant 0 : i32
    %c0_i32_0 = arith.constant 0 : i32
    %c0_i32_1 = arith.constant 0 : i32
    return %c0_i32, %c0_i32_0 : i32, i32
  }
  func.func @transform_3(%arg0: i32) -> (i32, i32) {
    %c0_i32 = arith.constant 0 : i32
    %c0_i32_0 = arith.constant 0 : i32
    return %arg0, %c0_i32 : i32, i32
  }
  func.func @transform_4(%arg0: i32) -> (i32, i32) {
    %c0_i32 = arith.constant 0 : i32
    %c0_i32_0 = arith.constant 0 : i32
    return %arg0, %c0_i32 : i32, i32
  }
  func.func @transform_5(%arg0: i32) -> (i32, i32) {
    %c0_i32 = arith.constant 0 : i32
    %c0_i32_0 = arith.constant 0 : i32
    return %arg0, %c0_i32 : i32, i32
  }
  func.func @transform_6(%arg0: i32) -> (i32, i32) {
    %c0_i32 = arith.constant 0 : i32
    %c0_i32_0 = arith.constant 0 : i32
    return %arg0, %c0_i32 : i32, i32
  }
  func.func @transform_7(%arg0: i32) -> (i32, i32) {
    %c0_i32 = arith.constant 0 : i32
    %c0_i32_0 = arith.constant 0 : i32
    return %arg0, %c0_i32 : i32, i32
  }
  func.func @transform_8(%arg0: i32) -> (i32, i32) {
    %c0_i32 = arith.constant 0 : i32
    %c0_i32_0 = arith.constant 0 : i32
    return %arg0, %c0_i32 : i32, i32
  }
}

</mosaic_0001>

<bundles_post_ra>
// kernel: tpu_custom_call.1
= control target key start
LH: loop header
LB: loop body
LE: loop exit
PB: predicated region body
PF: predicated region fallthrough
CT: control target
= control target key end

     0   :  { %14 = vsyncpa [#allocation3], 0  ;;  %s1331_s0 = inlined_call_operand.hbm [shape: bf16[16,128], index: 0, kind: input, shape index: {}]   ;;  %s1332_s1 = inlined_call_operand.hbm [shape: bf16[128,512], index: 1, kind: input, shape index: {}]   ;;  %s1333_s2 = inlined_call_operand.vmem [shape: f32[1,32], index: 2, kind: input, shape index: {}]   ;;  %s1334_s3 = inlined_call_operand.vmem [shape: bf16[16,128], index: 3, kind: input, shape index: {}]   ;;  %s1335_s4 = inlined_call_operand.hbm [shape: f32[16,128], index: 4, kind: input, shape index: {}]   ;;  %s1336_s5 = inlined_call_operand.hbm [shape: f32[16,384], index: 5, kind: input, shape index: {}]   ;;  %s1337_s6 = inlined_call_operand.hbm [shape: f32[16,128], index: 6, kind: output, shape index: {0}]   ;;  %s1338_s7 = inlined_call_operand.hbm [shape: f32[16,384], index: 7, kind: output, shape index: {1}]   ;;  %s1339_s8 = inlined_call_operand.hbm [shape: f32[16,128], index: 8, kind: output, shape index: {2}]  }
   0x1   :  { %15 = vsyncpa [#allocation6], 0 }
   0x2   :  { %16 = vsyncpa [#allocation9], 0 }
   0x3   :  { %17 = vsyncpa [#allocation4], 0 }
   0x4   :  { %18 = vsyncpa [#allocation12], 0  ;;  %s1032_s27 = smov [#allocation5]   ;;  %s868_s9 = scalar_lea.hbm %s1332_s1, 4096 }
   0x5   :  { %s36_s28 = sshll.u32 %s1032_s27, 4  ;;  %p869_p0 = scmp.ne.s32.totalorder %s1332_s1, %s868_s9  ;;  %s37_s28 = int_to_ptr.vmem [resolvable:$true] %s36_s28 }
   0x6   :  { %p872_p1 = scmp.lt.u32.totalorder %s868_s9, %s1332_s1 }
   0x8   :  { %p874_p2 = pnand %p872_p1, %p869_p0 }
   0xa   :  { %877 = shalt.err (!%p874_p2)
}
   0xb   :  { %s878_s14 = scalar_lea.vmem %s37_s28, 4096  ;;  %p883_p4 = scmp.lt.s32.totalorder %s37_s28, %s37_s28 }
   0xc   :  { %p879_p3 = scmp.ne.s32.totalorder %s37_s28, %s878_s14  ;;  %p884_p5 = scmp.lt.s32.totalorder %s878_s14, %s878_s14 }
   0xe   :  { %p885_p6 = por %p884_p5, %p883_p4 }
  0x10   :  { %p886_p7 = pnand %p885_p6, %p879_p3 }
  0x12   :  { %889 = shalt.err (!%p886_p7)
}
  0x13   :  { %s1033_s15 = smov 256   ;;  %s1034_s16 = smov 16  }
  0x14   :  { %42 = dma.hbm_to_vmem [thread:$0]  %s1332_s1, 4096, %s37_s28, [#allocation6], %s1033_s15, %s1033_s15, %s1034_s16  }
  0x15   :  { %s1035_s19 = smov [#allocation2]   ;;  %s890_s23 = scalar_lea.hbm %s1331_s0, 128 }
  0x16   :  { %s24_s20 = sshll.u32 %s1035_s19, 4  ;;  %p891_p8 = scmp.ne.s32.totalorder %s1331_s0, %s890_s23  ;;  %s25_s20 = int_to_ptr.vmem [resolvable:$true] %s24_s20 }
  0x17   :  { %p894_p9 = scmp.lt.u32.totalorder %s890_s23, %s1331_s0 }
  0x19   :  { %p896_p10 = pnand %p894_p9, %p891_p8 }
  0x1b   :  { %899 = shalt.err (!%p896_p10)
}
  0x1c   :  { %s900_s29 = scalar_lea.vmem %s25_s20, 128  ;;  %p905_p12 = scmp.lt.s32.totalorder %s25_s20, %s25_s20 }
  0x1d   :  { %p901_p11 = scmp.ne.s32.totalorder %s25_s20, %s900_s29  ;;  %p906_p13 = scmp.lt.s32.totalorder %s900_s29, %s900_s29 }
  0x1f   :  { %p907_p0 = por %p906_p13, %p905_p12 }
  0x21   :  { %p908_p1 = pnand %p907_p0, %p901_p11 }
  0x23   :  { %911 = shalt.err (!%p908_p1)
}
  0x24   :  { %s1036_s1 = smov 64   ;;  %s1037_s28 = smov 4  }
  0x25   :  { %30 = dma.hbm_to_vmem [thread:$0]  %s1331_s0, 128, %s25_s20, [#allocation3], %s1036_s1, %s1036_s1, %s1037_s28  }
  0x26   :  { %s1038_s10 = smov [#allocation7]   ;;  %s912_s14 = scalar_lea.hbm %s1335_s4, 256 }
  0x27   :  { %s52_s11 = sshll.u32 %s1038_s10, 4  ;;  %p913_p2 = scmp.ne.s32.totalorder %s1335_s4, %s912_s14  ;;  %s53_s11 = int_to_ptr.vmem [resolvable:$true] %s52_s11 }
  0x28   :  { %p916_p3 = scmp.lt.u32.totalorder %s912_s14, %s1335_s4 }
  0x2a   :  { %p918_p4 = pnand %p916_p3, %p913_p2 }
  0x2c   :  { %921 = shalt.err (!%p918_p4)
}
  0x2d   :  { %s922_s19 = scalar_lea.vmem %s53_s11, 256  ;;  %p927_p6 = scmp.lt.s32.totalorder %s53_s11, %s53_s11 }
  0x2e   :  { %p923_p5 = scmp.ne.s32.totalorder %s53_s11, %s922_s19  ;;  %p928_p7 = scmp.lt.s32.totalorder %s922_s19, %s922_s19 }
  0x30   :  { %p929_p8 = por %p928_p7, %p927_p6 }
  0x32   :  { %p930_p9 = pnand %p929_p8, %p923_p5 }
  0x34   :  { %933 = shalt.err (!%p930_p9)
}
  0x35   :  { %s1039_s0 = smov 128   ;;  %s1040_s20 = smov 8  }
  0x36   :  { %58 = dma.hbm_to_vmem [thread:$0]  %s1335_s4, 256, %s53_s11, [#allocation6], %s1039_s0, %s1039_s0, %s1040_s20  }
  0x37   :  { %s1041_s23 = smov [#allocation8]   ;;  %s934_s27 = scalar_lea.hbm %s1336_s5, 768 }
  0x38   :  { %s64_s24 = sshll.u32 %s1041_s23, 4  ;;  %p935_p10 = scmp.ne.s32.totalorder %s1336_s5, %s934_s27  ;;  %s65_s24 = int_to_ptr.vmem [resolvable:$true] %s64_s24 }
  0x39   :  { %p938_p11 = scmp.lt.u32.totalorder %s934_s27, %s1336_s5 }
  0x3b   :  { %p940_p12 = pnand %p938_p11, %p935_p10 }
  0x3d   :  { %943 = shalt.err (!%p940_p12)
}
  0x3e   :  { %s944_s9 = scalar_lea.vmem %s65_s24, 768  ;;  %p949_p0 = scmp.lt.s32.totalorder %s65_s24, %s65_s24 }
  0x3f   :  { %p945_p13 = scmp.ne.s32.totalorder %s65_s24, %s944_s9  ;;  %p950_p1 = scmp.lt.s32.totalorder %s944_s9, %s944_s9 }
  0x41   :  { %p951_p2 = por %p950_p1, %p949_p0 }
  0x43   :  { %p952_p3 = pnand %p951_p2, %p945_p13 }
  0x45   :  { %955 = shalt.err (!%p952_p3)
}
  0x46   :  { %s1042_s4 = smov 384   ;;  %s1043_s10 = smov 24  }
  0x47   :  { %70 = dma.hbm_to_vmem [thread:$0]  %s1336_s5, 768, %s65_s24, [#allocation9], %s1042_s4, %s1042_s4, %s1043_s10  }
  0x48   :  { %1022 = dma.done.wait [#allocation3], 128  }
  0x49   :  { %1023 = vsyncadd [#allocation3], 4294967168 }
  0x4a   :  { %1024 = dma.done.wait [#allocation6], 4352  }
  0x4b   :  { %1025 = vsyncadd [#allocation6], 4294962944 }
  0x4c   :  { %1026 = dma.done.wait [#allocation9], 768  }
  0x4d   :  { %1027 = vsyncadd [#allocation9], 4294966528  ;;  %v1044_v0 = vmov 0   ;;  %v786_v1 = vld [vmem:[#allocation5 + $0x4] ss:$16 sps:$4 sm:$0xff]   ;;  %v1149_v32 = vld [vmem:[#allocation2] sm:$0xff]  }
  0x4e   :  { %318 = vmatprep.mubr.bf16.mxu0 %v1044_v0  ;;  %361 = vmatprep.mubr.bf16.mxu1 %v1044_v0  ;;  %v788_v2 = vld [vmem:[#allocation5] ss:$16 sps:$4 sm:$0xff]   ;;  %v789_v3 = vld [vmem:[#allocation5 + $0xc] ss:$16 sps:$4 sm:$0xff]   ;;  %v791_v4 = vld [vmem:[#allocation5 + $0x8] ss:$16 sps:$4 sm:$0xff]  }
  0x4f   :  { %286 = vmatprep.subr.bf16.mxu0 %v786_v1  ;;  %v792_v5 = vld [vmem:[#allocation5 + $0x24] ss:$16 sps:$4 sm:$0xff]   ;;  %v794_v6 = vld [vmem:[#allocation5 + $0x20] ss:$16 sps:$4 sm:$0xff]   ;;  %329 = vmatprep.subr.bf16.mxu1 %v789_v3  ;;  %v795_v7 = vld [vmem:[#allocation5 + $0x2c] ss:$16 sps:$4 sm:$0xff]  }
  0x50   :  { %287 = vmatpush1.bf16.msra.mxu0 %v788_v2  ;;  %330 = vmatpush1.bf16.msra.mxu1 %v791_v4  ;;  %v797_v8 = vld [vmem:[#allocation5 + $0x28] ss:$16 sps:$4 sm:$0xff]   ;;  %v798_v9 = vld [vmem:[#allocation5 + $0x44] ss:$16 sps:$4 sm:$0xff]   ;;  %v800_v10 = vld [vmem:[#allocation5 + $0x40] ss:$16 sps:$4 sm:$0xff]  }
  0x51   :  { %288 = vmatprep.subr.bf16.mxu0 %v792_v5  ;;  %331 = vmatprep.subr.bf16.mxu1 %v795_v7  ;;  %v801_v11 = vld [vmem:[#allocation5 + $0x4c] ss:$16 sps:$4 sm:$0xff]   ;;  %v804_v12 = vld [vmem:[#allocation5 + $0x64] ss:$16 sps:$4 sm:$0xff]   ;;  %v803_v13 = vld [vmem:[#allocation5 + $0x48] ss:$16 sps:$4 sm:$0xff]  }
  0x52   :  { %v807_v14 = vld [vmem:[#allocation5 + $0x6c] ss:$16 sps:$4 sm:$0xff]   ;;  %v806_v15 = vld [vmem:[#allocation5 + $0x60] ss:$16 sps:$4 sm:$0xff]   ;;  %v810_v16 = vld [vmem:[#allocation5 + $0x84] ss:$16 sps:$4 sm:$0xff]  }
  0x53   :  { %v809_v17 = vld [vmem:[#allocation5 + $0x68] ss:$16 sps:$4 sm:$0xff]   ;;  %v813_v18 = vld [vmem:[#allocation5 + $0x8c] ss:$16 sps:$4 sm:$0xff]   ;;  %v812_v19 = vld [vmem:[#allocation5 + $0x80] ss:$16 sps:$4 sm:$0xff]  }
  0x54   :  { %289 = vmatpush1.bf16.msra.mxu0 %v794_v6  ;;  %332 = vmatpush1.bf16.msra.mxu1 %v797_v8  ;;  %v816_v20 = vld [vmem:[#allocation5 + $0xa4] ss:$16 sps:$4 sm:$0xff]   ;;  %v815_v21 = vld [vmem:[#allocation5 + $0x88] ss:$16 sps:$4 sm:$0xff]   ;;  %v819_v22 = vld [vmem:[#allocation5 + $0xac] ss:$16 sps:$4 sm:$0xff]  }
  0x55   :  { %290 = vmatprep.subr.bf16.mxu0 %v798_v9  ;;  %333 = vmatprep.subr.bf16.mxu1 %v801_v11  ;;  %v818_v23 = vld [vmem:[#allocation5 + $0xa0] ss:$16 sps:$4 sm:$0xff]   ;;  %v822_v24 = vld [vmem:[#allocation5 + $0xc4] ss:$16 sps:$4 sm:$0xff]   ;;  %v821_v25 = vld [vmem:[#allocation5 + $0xa8] ss:$16 sps:$4 sm:$0xff]  }
  0x56   :  { %v825_v26 = vld [vmem:[#allocation5 + $0xcc] ss:$16 sps:$4 sm:$0xff]   ;;  %v824_v27 = vld [vmem:[#allocation5 + $0xc0] ss:$16 sps:$4 sm:$0xff]   ;;  %v828_v28 = vld [vmem:[#allocation5 + $0xe4] ss:$16 sps:$4 sm:$0xff]  }
  0x57   :  { %v827_v29 = vld [vmem:[#allocation5 + $0xc8] ss:$16 sps:$4 sm:$0xff]   ;;  %v831_v30 = vld [vmem:[#allocation5 + $0xec] ss:$16 sps:$4 sm:$0xff]   ;;  %v830_v31 = vld [vmem:[#allocation5 + $0xe0] ss:$16 sps:$4 sm:$0xff]  }
  0x58   :  { %291 = vmatpush1.bf16.msra.mxu0 %v800_v10  ;;  %334 = vmatpush1.bf16.msra.mxu1 %v803_v13  ;;  %v833_v33 = vld [vmem:[#allocation5 + $0xe8] ss:$16 sps:$4 sm:$0xff]   ;;  %v391_v35 = vld [vmem:[%s1334_s3 + $0x4] sm:$0xf]  ;;  %v486_v41 = vld [vmem:[#allocation8] sm:$0xff]  ;;  %vm383_vm13 = vcmask 261120  }
  0x59   :  { %292 = vmatprep.subr.bf16.mxu0 %v804_v12  ;;  %335 = vmatprep.subr.bf16.mxu1 %v807_v14  ;;  %v390_v34 = vld [vmem:[%s1334_s3] sm:$0xf]  ;;  %vm393_vm1 = vcmp.gt.bf16.partialorder %v391_v35, 0  ;;  %v426_v42 = vld [vmem:[#allocation7] sm:$0xff]  ;;  %v489_v49 = vld [vmem:[#allocation8 + $0x18] sm:$0xff] }
  0x5a   :  { %vm392_vm0 = vcmp.gt.bf16.partialorder %v390_v34, 0  ;;  %v395_v37 = vsel %vm393_vm1, 65537, %v1044_v0  ;;  %v487_v44 = vld [vmem:[#allocation8 + $0x8] sm:$0xff]  ;;  %v488_v48 = vld [vmem:[#allocation8 + $0x10] sm:$0xff]  ;;  %v490_v54 = vld [vmem:[#allocation8 + $0x20] sm:$0xff] }
  0x5b   :  { %v394_v36 = vsel %vm392_vm0, 65537, %v1044_v0  ;;  %v397_v39 = vunpack.c.l.b16 %v395_v37  ;;  %v491_v61 = vld [vmem:[#allocation8 + $0x28] sm:$0xff]  ;;  %v427_v8 = vld [vmem:[#allocation7 + $0x8] sm:$0xff] }
  0x5c   :  { %293 = vmatpush1.bf16.msra.mxu0 %v806_v15  ;;  %336 = vmatpush1.bf16.msra.mxu1 %v809_v17  ;;  %v396_v38 = vunpack.c.l.b16 %v394_v36 }
  0x5d   :  { %294 = vmatprep.subr.bf16.mxu0 %v810_v16  ;;  %337 = vmatprep.subr.bf16.mxu1 %v813_v18  ;;  %vm1165_vm3 = vcmp.ne.s32.totalorder %v397_v39, 0 }
  0x5e   :  { %vm1161_vm2 = vcmp.ne.s32.totalorder %v396_v38, 0 }
  0x60   :  { %295 = vmatpush1.bf16.msra.mxu0 %v812_v19  ;;  %338 = vmatpush1.bf16.msra.mxu1 %v815_v21 }
  0x61   :  { %296 = vmatprep.subr.bf16.mxu0 %v816_v20  ;;  %339 = vmatprep.subr.bf16.mxu1 %v819_v22 }
  0x64   :  { %297 = vmatpush1.bf16.msra.mxu0 %v818_v23  ;;  %340 = vmatpush1.bf16.msra.mxu1 %v821_v25 }
  0x65   :  { %298 = vmatprep.subr.bf16.mxu0 %v822_v24  ;;  %341 = vmatprep.subr.bf16.mxu1 %v825_v26 }
  0x68   :  { %299 = vmatpush1.bf16.msra.mxu0 %v824_v27  ;;  %342 = vmatpush1.bf16.msra.mxu1 %v827_v29 }
  0x69   :  { %300 = vmatprep.subr.bf16.mxu0 %v828_v28  ;;  %343 = vmatprep.subr.bf16.mxu1 %v831_v30 }
  0x6c   :  { %301 = vmatpush1.bf16.msra.mxu0 %v830_v31  ;;  %344 = vmatpush1.bf16.msra.mxu1 %v833_v33 }
  0x6f   :  { %319 = vmatmul.mubr.bf16.vlgmr.msra.gmra.mrb[0].mxu0 %v1149_v32  ;;  %362 = vmatmul.mubr.bf16.vlgmr.msra.gmra.mrb[0].mxu1 %v1149_v32 }
 0x142   :  { %v320_v43 = vpop.f32.mrb[0].mxu0  ;;  %v363_v52 = vpop.f32.mrb[0].mxu1 }
 0x143   :  { %v1171_v46 = vsel %vm1161_vm2, %v320_v43, -1e+08  ;;  %v322_v47 = vpop.f32.mrb[1].mxu0  ;;  %v494_v56 = vadd.f32 %v487_v44, %v363_v52  ;;  %v532_v57 = vmul.f32 %v363_v52, %v363_v52  ;;  %v365_v58 = vpop.f32.mrb[1].mxu1 }
 0x144   :  { %v492_v50 = vadd.f32 %v486_v41, %v322_v47  ;;  %v530_v51 = vmul.f32 %v322_v47, %v322_v47  ;;  %402 = vmax.xlane.f32.xlu1 %v1171_v46  ;;  %v324_v53 = vpop.f32.mrb[2].mxu0  ;;  %v1175_v55 = vadd.f32 %v426_v42, %v1171_v46  ;;  %v496_v63 = vadd.f32 %v488_v48, %v365_v58  ;;  %v367_v2 = vpop.f32.mrb[2].mxu1 }
 0x145   :  { %v1179_v59 = vsel %vm1165_vm3, %v324_v53, -1e+08  ;;  %v326_v60 = vpop.f32.mrb[3].mxu0  ;;  %v536_v0 = vmul.f32 %v365_v58, %v365_v58  ;;  %v500_v3 = vmul.f32 %v494_v56, %v494_v56  ;;  %v495_v6 = vadd.f32 %v490_v54, %v367_v2  ;;  %v369_v7 = vpop.f32.mrb[3].mxu1 }
 0x146   :  { %v498_v62 = vmul.f32 %v492_v50, %v492_v50  ;;  %v493_v1 = vadd.f32 %v489_v49, %v326_v60  ;;  %430 = vmax.xlane.f32.xlu0 %v1175_v55  ;;  %v534_v4 = vadd.f32 %v532_v57, %v530_v51  ;;  %v531_v5 = vmul.f32 %v326_v60, %v326_v60 }
 0x147   :  { %v504_v9 = vmul.f32 %v496_v63, %v496_v63  ;;  %v533_v11 = vmul.f32 %v367_v2, %v367_v2  ;;  %v497_v12 = vadd.f32 %v491_v61, %v369_v7  ;;  %v501_v15 = vmul.f32 %v495_v6, %v495_v6 }
 0x148   :  { %v499_v10 = vmul.f32 %v493_v1, %v493_v1  ;;  %404 = vmax.xlane.f32.xlu1 %v1179_v59  ;;  %v502_v13 = vadd.f32 %v500_v3, %v498_v62  ;;  %v1183_v14 = vadd.f32 %v536_v0, %v534_v4  ;;  %v537_v16 = vmul.f32 %v369_v7, %v369_v7 }
 0x149   :  { %v535_v17 = vadd.f32 %v533_v11, %v531_v5  ;;  %v505_v18 = vmul.f32 %v497_v12, %v497_v12  ;;  %v1186_v19 = vadd.f32 %v427_v8, %v1179_v59 }
 0x14a   :  { %v506_v20 = vadd.f32 %v504_v9, %v502_v13  ;;  %v503_v21 = vadd.f32 %v501_v15, %v499_v10 }
 0x14b   :  { %v1188_v22 = vadd.f32 %v537_v16, %v535_v17  ;;  %432 = vmax.xlane.f32.xlu0 %v1186_v19 }
 0x14c   :  { %v508_v23 = vmax.f32 %v506_v20, 1e-20  ;;  %v507_v24 = vadd.f32 %v505_v18, %v503_v21 }
 0x14e   :  { %836 = vrsqrt.f32 %v508_v23  ;;  %v509_v25 = vmax.f32 %v507_v24, 1e-20 }
 0x150   :  { %838 = vrsqrt.f32 %v509_v25 }
 0x158   :  { %v837_v26 = vpop.eup %836 }
 0x159   :  { %v512_v27 = vmul.f32 %v837_v26, %v492_v50  ;;  %v514_v28 = vmul.f32 %v837_v26, %v494_v56  ;;  %v516_v29 = vmul.f32 %v837_v26, %v496_v63 }
 0x15a   :  { %v839_v30 = vpop.eup %838 }
 0x15b   :  { %v518_v31 = vmul.f32 %v512_v27, %v322_v47  ;;  %v520_v33 = vmul.f32 %v514_v28, %v363_v52  ;;  %v524_v34 = vmul.f32 %v516_v29, %v365_v58  ;;  %668 = vst [vmem:[#allocation11] sm:$0xff] %v512_v27  ;;  %670 = vst [vmem:[#allocation11 + $0x8] sm:$0xff] %v514_v28 }
 0x15c   :  { %672 = vst [vmem:[#allocation11 + $0x10] sm:$0xff] %v516_v29  ;;  %v513_v35 = vmul.f32 %v839_v30, %v493_v1  ;;  %v515_v36 = vmul.f32 %v839_v30, %v495_v6  ;;  %v517_v37 = vmul.f32 %v839_v30, %v497_v12 }
 0x15d   :  { %v522_v38 = vadd.f32 %v520_v33, %v518_v31 }
 0x15e   :  { %v519_v39 = vmul.f32 %v513_v35, %v326_v60  ;;  %669 = vst [vmem:[#allocation11 + $0x18] sm:$0xff] %v513_v35  ;;  %v521_v41 = vmul.f32 %v515_v36, %v367_v2  ;;  %v525_v42 = vmul.f32 %v517_v37, %v369_v7  ;;  %671 = vst [vmem:[#allocation11 + $0x20] sm:$0xff] %v515_v36 }
 0x15f   :  { %673 = vst [vmem:[#allocation11 + $0x28] sm:$0xff] %v517_v37  ;;  %v1191_v43 = vadd.f32 %v524_v34, %v522_v38 }
 0x160   :  { %v523_v44 = vadd.f32 %v521_v41, %v519_v39 }
 0x161   :  { %v1195_v47 = vmul.f32 %v1191_v43, %v1191_v43  ;;  %v552_v48 = vand.u32 2147483647, %v1191_v43  ;;  %v602_v49 = vsub.f32 0.0, %v1191_v43  ;;  %vm584_vm4 = vcmp.ge.f32.partialorder %v1191_v43, 0.0 }
 0x162   :  { %v1199_v50 = vadd.f32 %v525_v42, %v523_v44  ;;  %vm628_vm6 = vcmp.lt.f32.partialorder %v1191_v43, -4.0 }
 0x163   :  { %v540_v51 = vsub.f32 %v1183_v14, %v1195_v47  ;;  %v554_v52 = vmul.f32 0.70710677, %v552_v48  ;;  %v604_v53 = vmax.f32 %v602_v49, 1.0  ;;  %v546_v5 = vmul.f32 -0.5, %v1195_v47 }
 0x164   :  { %v1205_v54 = vmul.f32 %v1199_v50, %v1199_v50  ;;  %v553_v56 = vand.u32 2147483647, %v1199_v50  ;;  %v603_v57 = vsub.f32 0.0, %v1199_v50  ;;  %vm585_vm5 = vcmp.ge.f32.partialorder %v1199_v50, 0.0 }
 0x165   :  { %v556_v58 = vmul.f32 0.3275911, %v554_v52  ;;  %840 = vrcp.f32 %v604_v53  ;;  %v548_v12 = vmul.f32 1.442695, %v546_v5  ;;  %v592_v5 = vmul.f32 0.3989423, %v1191_v43 }
 0x166   :  { %v541_v60 = vsub.f32 %v1188_v22, %v1205_v54  ;;  %v555_v61 = vmul.f32 0.70710677, %v553_v56  ;;  %v605_v62 = vmax.f32 %v603_v57, 1.0  ;;  %v547_v9 = vmul.f32 -0.5, %v1205_v54 }
 0x167   :  { %v558_v63 = vadd.f32 1.0, %v556_v58  ;;  %vm629_vm7 = vcmp.lt.f32.partialorder %v1199_v50, -4.0 }
 0x168   :  { %v557_v0 = vmul.f32 0.3275911, %v555_v61  ;;  %842 = vrcp.f32 %v605_v62  ;;  %v550_v20 = vmul.f32 1.442695, %v547_v9 }
 0x169   :  { %844 = vrcp.f32 %v558_v63 }
 0x16a   :  { %v559_v1 = vadd.f32 1.0, %v557_v0 }
 0x16c   :  { %846 = vrcp.f32 %v559_v1 }
 0x16d   :  { %848 = vpow2.f32 %v548_v12 }
 0x16e   :  { %850 = vpow2.f32 %v550_v20 }
 0x16f   :  { %v1211_v2 = vpop.eup %840 }
 0x170   :  { %v608_v6 = vmul.f32 %v1211_v2, %v1211_v2 }
 0x172   :  { %v1213_v3 = vpop.eup %842  ;;  %v610_v15 = vmul.f32 6.0, %v608_v6  ;;  %v614_v16 = vmul.f32 45.0, %v608_v6 }
 0x173   :  { %v845_v4 = vpop.eup %844  ;;  %v609_v11 = vmul.f32 %v1213_v3, %v1213_v3 }
 0x174   :  { %v564_v7 = vmul.f32 1.0614054, %v845_v4  ;;  %v612_v26 = vsub.f32 1.0, %v610_v15  ;;  %v616_v27 = vmul.f32 %v614_v16, %v608_v6  ;;  %v597_v15 = vadd.f32 1.0, %v1205_v54 }
 0x175   :  { %v611_v23 = vmul.f32 6.0, %v609_v11  ;;  %v615_v24 = vmul.f32 45.0, %v609_v11 }
 0x176   :  { %v847_v8 = vpop.eup %846  ;;  %v764_v10 = vadd.f32 -1.4531521, %v564_v7  ;;  %v618_v35 = vadd.f32 %v616_v27, %v612_v26  ;;  %v596_v7 = vadd.f32 1.0, %v1195_v47 }
 0x177   :  { %v565_v13 = vmul.f32 1.0614054, %v847_v8  ;;  %v613_v31 = vsub.f32 1.0, %v611_v23  ;;  %v617_v33 = vmul.f32 %v615_v24, %v609_v11  ;;  %v849_v48 = vpop.eup %848 }
 0x178   :  { %v568_v17 = vmul.f32 %v845_v4, %v764_v10  ;;  %v620_v42 = vmax.f32 %v618_v35, 0.04  ;;  %v851_v58 = vpop.eup %850  ;;  %v594_v12 = vmul.f32 %v849_v48, %v592_v5  ;;  %v543_v35 = vmul.f32 -0.5, %v541_v60 }
 0x179   :  { %v765_v18 = vadd.f32 -1.4531521, %v565_v13  ;;  %v619_v39 = vadd.f32 %v617_v33, %v613_v31 }
 0x17a   :  { %v570_v21 = vadd.f32 1.4214138, %v568_v17  ;;  %v622_v57 = vmul.f32 2.0, %v620_v42 }
 0x17b   :  { %v569_v25 = vmul.f32 %v847_v8, %v765_v18  ;;  %v621_v53 = vmax.f32 %v619_v39, 0.04 }
 0x17c   :  { %v572_v28 = vmul.f32 %v845_v4, %v570_v21  ;;  %v624_v9 = vmul.f32 %v622_v57, %v608_v6 }
 0x17d   :  { %v571_v29 = vadd.f32 1.4214138, %v569_v25  ;;  %v623_v0 = vmul.f32 2.0, %v621_v53 }
 0x17e   :  { %v766_v30 = vadd.f32 -0.28449672, %v572_v28  ;;  %v626_v20 = vmul.f32 %v1211_v2, %v624_v9 }
 0x17f   :  { %v573_v34 = vmul.f32 %v847_v8, %v571_v29  ;;  %v625_v16 = vmul.f32 %v623_v0, %v609_v11  ;;  %v638_v29 = vmul.f32 0.5, %v1195_v47 }
 0x180   :  { %v576_v36 = vmul.f32 %v845_v4, %v766_v30  ;;  %v542_v30 = vmul.f32 -0.5, %v540_v51  ;;  %v434_v51 = vlaneseq }
 0x181   :  { %v767_v37 = vadd.f32 -0.28449672, %v573_v34  ;;  %v627_v25 = vmul.f32 %v1213_v3, %v625_v16  ;;  %v639_v34 = vmul.f32 0.5, %v1205_v54 }
 0x182   :  { %v578_v38 = vadd.f32 0.2548296, %v576_v36 }
 0x183   :  { %v577_v41 = vmul.f32 %v847_v8, %v767_v37  ;;  %v762_v37 = vadd.f32 -1.837877, %v542_v30 }
 0x184   :  { %v580_v44 = vmul.f32 %v845_v4, %v578_v38 }
 0x185   :  { %v579_v49 = vadd.f32 0.2548296, %v577_v41 }
 0x186   :  { %v582_v52 = vmul.f32 %v849_v48, %v580_v44  ;;  %v763_v44 = vadd.f32 -1.837877, %v543_v35  ;;  %v373_v35 = vunpack.c.h.bf16 %v1149_v32 }
 0x187   :  { %v581_v56 = vmul.f32 %v847_v8, %v579_v49  ;;  %v593_v8 = vmul.f32 0.3989423, %v1199_v50  ;;  %v1247_v49 = vand.u32 127, %v434_v51 }
 0x188   :  { %v586_v61 = vmul.f32 0.5, %v582_v52 }
 0x189   :  { %v583_v62 = vmul.f32 %v851_v58, %v581_v56  ;;  %v595_v21 = vmul.f32 %v851_v58, %v593_v8 }
 0x18a   :  { %v588_v63 = vsub.f32 1.0, %v586_v61 }
 0x18b   :  { %v587_v1 = vmul.f32 0.5, %v583_v62 }
 0x18c   :  { %v590_v4 = vsel %vm584_vm4, %v588_v63, %v586_v61 }
 0x18d   :  { %v589_v10 = vsub.f32 1.0, %v587_v1  ;;  %v598_v13 = vmul.f32 %v596_v7, %v590_v4 }
 0x18f   :  { %v591_v17 = vsel %vm585_vm5, %v589_v10, %v587_v1  ;;  %v600_v18 = vadd.f32 %v598_v13, %v594_v12 }
 0x190   :  { %v599_v23 = vmul.f32 %v597_v15, %v591_v17 }
 0x191   :  { %v630_v6 = vsel %vm628_vm6, %v626_v20, %v600_v18 }
 0x192   :  { %v601_v24 = vadd.f32 %v599_v23, %v595_v21  ;;  %v632_v26 = vmax.f32 %v630_v6, 1e-30 }
 0x194   :  { %v631_v11 = vsel %vm629_vm7, %v627_v25, %v601_v24  ;;  %852 = vlog2.f32 %v632_v26 }
 0x195   :  { %v633_v27 = vmax.f32 %v631_v11, 1e-30 }
 0x197   :  { %854 = vlog2.f32 %v633_v27 }
 0x19e   :  { %v853_v2 = vpop.eup %852 }
 0x19f   :  { %v635_v28 = vmul.f32 0.6931472, %v853_v2 }
 0x1a1   :  { %v855_v31 = vpop.eup %854  ;;  %v640_v33 = vsub.f32 %v635_v28, %v638_v29 }
 0x1a2   :  { %v637_v3 = vmul.f32 0.6931472, %v855_v31  ;;  %v761_v31 = vld [vmem:[%s1333_s2] ss:$0 sm:$0xff]  ;;  %s1045_s2 = smov [#allocation11]  }
 0x1a3   :  { %v768_v36 = vadd.f32 -0.9189385, %v640_v33  ;;  %s695_s17 = sshll.u32 %s1045_s2, 4  ;;  %s696_s17 = int_to_ptr.vmem [resolvable:$true] %s695_s17 }
 0x1a4   :  { %v641_v38 = vsub.f32 %v637_v3, %v639_v34  ;;  %s956_s18 = scalar_lea.vmem %s696_s17, 768  ;;  %p961_p5 = scmp.lt.s32.totalorder %s696_s17, %s696_s17 }
 0x1a5   :  { %v644_v39 = vsel %vm628_vm6, %v768_v36, %v635_v28  ;;  %v372_v28 = vunpack.c.l.bf16 %v1149_v32  ;;  %p957_p4 = scmp.ne.s32.totalorder %s696_s17, %s956_s18  ;;  %p962_p6 = scmp.lt.s32.totalorder %s956_s18, %s956_s18 }
 0x1a6   :  { %v769_v41 = vadd.f32 -0.9189385, %v641_v38  ;;  %v674_v42 = vadd.f32 %v762_v37, %v644_v39 }
 0x1a7   :  { %p963_p7 = por %p962_p6, %p961_p5 }
 0x1a8   :  { %v645_v14 = vsel %vm629_vm7, %v769_v41, %v637_v3  ;;  %676 = vst [vmem:[#allocation13] sm:$0xff] %v674_v42  ;;  %v381_v3 = vmul.f32 %v761_v31, %v372_v28  ;;  %v382_v41 = vmul.f32 %v761_v31, %v373_v35 }
 0x1a9   :  { %v675_v47 = vadd.f32 %v763_v44, %v645_v14  ;;  %p964_p8 = pnand %p963_p7, %p957_p4 }
 0x1aa   :  { %v384_v38 = vsel %vm383_vm13, %v381_v3, 0.0  ;;  %v387_v44 = vsel %vm383_vm13, %v382_v41, 0.0 }
 0x1ab   :  { %677 = vst [vmem:[#allocation13 + $0x8] sm:$0xff] %v675_v47 }
 0x1d1   :  { %v403_v48 = vpop.xlane.xlu1 %402 }
 0x1d2   :  { %v406_v22 = vsub.f32 %v1171_v46, %v403_v48 }
 0x1d3   :  { %v431_v54 = vpop.xlane.xlu0 %430 }
 0x1d4   :  { %v408_v60 = vmul.f32 1.442695, %v406_v22  ;;  %vm436_vm8 = vcmp.eq.f32.partialorder %v1175_v55, %v431_v54 }
 0x1d5   :  { %v438_v43 = vsel %vm436_vm8, %v1247_v49, 128  ;;  %v405_v52 = vpop.xlane.xlu1 %404 }
 0x1d6   :  { %856 = vpow2.f32 %v408_v60  ;;  %v407_v50 = vsub.f32 %v1179_v59, %v405_v52  ;;  %v441_v53 = vshra.s32 %v438_v43, 16  ;;  %v440_v0 = vand.u32 65535, %v438_v43 }
 0x1d8   :  { %v410_v56 = vmul.f32 1.442695, %v407_v50  ;;  %v443_v57 = vcvt.s32.f32 %v441_v53  ;;  %v433_v58 = vpop.xlane.xlu0 %432  ;;  %v442_v59 = vcvt.s32.f32 %v440_v0 }
 0x1d9   :  { %vm437_vm9 = vcmp.eq.f32.partialorder %v1186_v19, %v433_v58 }
 0x1da   :  { %858 = vpow2.f32 %v410_v56  ;;  %444 = vmin.xlane.f32.xlu0 %v443_v57  ;;  %v439_v46 = vsel %vm437_vm9, %v1247_v49, 128 }
 0x1db   :  { %v455_v61 = vshra.s32 %v439_v46, 16  ;;  %v454_v5 = vand.u32 65535, %v439_v46 }
 0x1dd   :  { %v457_v62 = vcvt.s32.f32 %v455_v61  ;;  %v456_v4 = vcvt.s32.f32 %v454_v5 }
 0x1df   :  { %458 = vmin.xlane.f32.xlu1 %v457_v62 }
 0x1e0   :  { %v857_v63 = vpop.eup %856 }
 0x1e1   :  { %412 = vadd.xlane.f32.xlu0 %v857_v63 }
 0x1e4   :  { %v859_v55 = vpop.eup %858 }
 0x1e5   :  { %414 = vadd.xlane.f32.xlu1 %v859_v55 }
 0x267   :  { %v445_v1 = vpop.xlane.xlu0 %444 }
 0x268   :  { %vm446_vm10 = vcmp.eq.f32.partialorder %v443_v57, %v445_v1  ;;  %v451_v27 = vcvt.f32.s32 %v445_v1 }
 0x269   :  { %v447_v7 = vsel %vm446_vm10, %v442_v59, inf }
 0x26a   :  { %448 = vmin.xlane.f32.xlu0 %v447_v7  ;;  %v452_v29 = vshll.u32 %v451_v27, 16 }
 0x26c   :  { %v459_v9 = vpop.xlane.xlu1 %458 }
 0x26d   :  { %vm460_vm11 = vcmp.eq.f32.partialorder %v457_v62, %v459_v9  ;;  %v465_v40 = vcvt.f32.s32 %v459_v9 }
 0x26e   :  { %v413_v19 = vpop.xlane.xlu0 %412  ;;  %v461_v10 = vsel %vm460_vm11, %v456_v4, inf }
 0x26f   :  { %860 = vlog2.f32 %v413_v19  ;;  %462 = vmin.xlane.f32.xlu1 %v461_v10  ;;  %v466_v36 = vshll.u32 %v465_v40, 16 }
 0x270   :  { %862 = vrcp.f32 %v413_v19 }
 0x272   :  { %v415_v12 = vpop.xlane.xlu1 %414 }
 0x273   :  { %864 = vlog2.f32 %v415_v12 }
 0x274   :  { %866 = vrcp.f32 %v415_v12 }
 0x279   :  { %v861_v13 = vpop.eup %860 }
 0x27a   :  { %v863_v8 = vpop.eup %862  ;;  %v417_v15 = vmul.f32 0.6931472, %v861_v13 }
 0x27b   :  { %v424_v17 = vmul.f32 %v863_v8, %v857_v63 }
 0x27c   :  { %v420_v16 = vsub.f32 %v406_v22, %v417_v15 }
 0x27d   :  { %v865_v18 = vpop.eup %864 }
 0x27e   :  { %v867_v20 = vpop.eup %866  ;;  %v419_v21 = vmul.f32 0.6931472, %v865_v18  ;;  %v476_v23 = vmul.f32 %v424_v17, %v420_v16 }
 0x27f   :  { %v425_v25 = vmul.f32 %v867_v20, %v859_v55 }
 0x280   :  { %v478_v6 = vsel %vm1161_vm2, %v476_v23, 0.0  ;;  %v421_v24 = vsub.f32 %v407_v50, %v419_v21 }
 0x281   :  { %480 = vadd.xlane.f32.xlu0 %v478_v6 }
 0x282   :  { %v477_v26 = vmul.f32 %v425_v25, %v421_v24 }
 0x284   :  { %v479_v11 = vsel %vm1165_vm3, %v477_v26, 0.0 }
 0x285   :  { %482 = vadd.xlane.f32.xlu1 %v479_v11 }
 0x2f7   :  { %v449_v2 = vpop.xlane.xlu0 %448 }
 0x2f8   :  { %v450_v30 = vcvt.f32.s32 %v449_v2 }
 0x2fa   :  { %v453_v33 = vadd.s32 %v452_v29, %v450_v30 }
 0x2fc   :  { %vm468_vm12 = vcmp.eq.s32.totalorder %v1247_v49, %v453_v33  ;;  %v463_v34 = vpop.xlane.xlu1 %462 }
 0x2fd   :  { %v470_v45 = vsel %vm468_vm12, %v420_v16, 0.0  ;;  %v464_v37 = vcvt.f32.s32 %v463_v34 }
 0x2fe   :  { %472 = vadd.xlane.f32.xlu0 %v470_v45 }
 0x2ff   :  { %v467_v39 = vadd.s32 %v466_v36, %v464_v37 }
 0x301   :  { %vm469_vm14 = vcmp.eq.s32.totalorder %v1247_v49, %v467_v39 }
 0x302   :  { %385 = vadd.xlane.f32.xlu0 %v384_v38  ;;  %v471_v42 = vsel %vm469_vm14, %v421_v24, 0.0 }
 0x303   :  { %474 = vadd.xlane.f32.xlu1 %v471_v42 }
 0x307   :  { %388 = vadd.xlane.f32.xlu1 %v387_v44 }
 0x308   :  { %967 = shalt.err (!%p964_p8)
}
 0x309   :  { %s968_s22 = scalar_lea.hbm %s1338_s7, 768 }
 0x30a   :  { %p969_p9 = scmp.ne.s32.totalorder %s1338_s7, %s968_s22  ;;  %p972_p10 = scmp.lt.u32.totalorder %s968_s22, %s1338_s7 }
 0x30c   :  { %p974_p11 = pnand %p972_p10, %p969_p9 }
 0x30e   :  { %977 = shalt.err (!%p974_p11)
}
 0x30f   :  { %701 = dma.vmem_to_hbm [thread:$0]  %s696_s17, 768, %s1338_s7, [#allocation12], %s1042_s4, %s1042_s4, %s1043_s10  }
 0x310   :  { %s1046_s1 = smov [#allocation13]  }
 0x311   :  { %s707_s28 = sshll.u32 %s1046_s1, 4  ;;  %s708_s28 = int_to_ptr.vmem [resolvable:$true] %s707_s28 }
 0x312   :  { %s978_s30 = scalar_lea.vmem %s708_s28, 256  ;;  %p983_p13 = scmp.lt.s32.totalorder %s708_s28, %s708_s28 }
 0x313   :  { %p979_p12 = scmp.ne.s32.totalorder %s708_s28, %s978_s30  ;;  %p984_p0 = scmp.lt.s32.totalorder %s978_s30, %s978_s30 }
 0x315   :  { %p985_p1 = por %p984_p0, %p983_p13 }
 0x317   :  { %p986_p2 = pnand %p985_p1, %p979_p12 }
 0x319   :  { %989 = shalt.err (!%p986_p2)
}
 0x31a   :  { %s990_s12 = scalar_lea.hbm %s1339_s8, 256 }
 0x31b   :  { %p991_p3 = scmp.ne.s32.totalorder %s1339_s8, %s990_s12  ;;  %p994_p4 = scmp.lt.u32.totalorder %s990_s12, %s1339_s8 }
 0x31d   :  { %p996_p5 = pnand %p994_p4, %p991_p3 }
 0x31f   :  { %999 = shalt.err (!%p996_p5)
}
 0x320   :  { %713 = dma.vmem_to_hbm [thread:$0]  %s708_s28, 256, %s1339_s8, [#allocation12], %s1039_s0, %s1039_s0, %s1040_s20   ;;  %v481_v32 = vpop.xlane.xlu0 %480  ;;  %v647_v14 = vcvt.s32.f32 %v453_v33  ;;  %vm646_vm15 = vcmp.eq.s32.totalorder %v1247_v49, 0  ;;  %vm651_vm0 = vcmp.eq.s32.totalorder %v1247_v49, 1  ;;  %vm656_vm1 = vcmp.eq.s32.totalorder %v1247_v49, 2  ;;  %v483_v54 = vpop.xlane.xlu1 %482 }
 0x321   :  { %v484_v47 = vsub.f32 0.0, %v481_v32  ;;  %vm661_vm2 = vcmp.eq.s32.totalorder %v1247_v49, 3  ;;  %v648_v52 = vcvt.s32.f32 %v467_v39  ;;  %v485_v56 = vsub.f32 0.0, %v483_v54  ;;  %s1047_s8 = smov [#allocation10]  }
 0x322   :  { %v649_v48 = vsel %vm646_vm15, %v647_v14, 0.0  ;;  %s683_s15 = sshll.u32 %s1047_s8, 4  ;;  %s684_s15 = int_to_ptr.vmem [resolvable:$true] %s683_s15 }
 0x323   :  { %v657_v43 = vsel %vm656_vm1, %v484_v47, 0.0  ;;  %v650_v61 = vsel %vm646_vm15, %v648_v52, 0.0  ;;  %v658_v55 = vsel %vm656_vm1, %v485_v56, 0.0  ;;  %s1000_s3 = scalar_lea.vmem %s684_s15, 256  ;;  %p1005_p7 = scmp.lt.s32.totalorder %s684_s15, %s684_s15 }
 0x324   :  { %p1001_p6 = scmp.ne.s32.totalorder %s684_s15, %s1000_s3  ;;  %p1006_p8 = scmp.lt.s32.totalorder %s1000_s3, %s1000_s3 }
 0x326   :  { %p1007_p9 = por %p1006_p8, %p1005_p7 }
 0x328   :  { %p1008_p10 = pnand %p1007_p9, %p1001_p6 }
 0x38b   :  { %v473_v51 = vpop.xlane.xlu0 %472 }
 0x38c   :  { %v652_v22 = vsel %vm651_vm0, %v473_v51, 0.0 }
 0x38d   :  { %v654_v60 = vadd.f32 %v652_v22, %v649_v48 }
 0x38f   :  { %v659_v50 = vadd.f32 %v657_v43, %v654_v60  ;;  %v386_v53 = vpop.xlane.xlu0 %385 }
 0x390   :  { %v662_v57 = vsel %vm661_vm2, %v386_v53, 0.0  ;;  %v475_v58 = vpop.xlane.xlu1 %474 }
 0x391   :  { %v664_v46 = vadd.f32 %v662_v57, %v659_v50  ;;  %v653_v62 = vsel %vm651_vm0, %v475_v58, 0.0 }
 0x392   :  { %v655_v63 = vadd.f32 %v653_v62, %v650_v61 }
 0x393   :  { %666 = vst [vmem:[#allocation10] sm:$0xff] %v664_v46 }
 0x394   :  { %v660_v0 = vadd.f32 %v658_v55, %v655_v63  ;;  %v389_v1 = vpop.xlane.xlu1 %388 }
 0x395   :  { %v663_v59 = vsel %vm661_vm2, %v389_v1, 0.0 }
 0x396   :  { %v665_v5 = vadd.f32 %v663_v59, %v660_v0 }
 0x398   :  { %667 = vst [vmem:[#allocation10 + $0x8] sm:$0xff] %v665_v5 }
 0x399   :  { %1011 = shalt.err (!%p1008_p10)
}
 0x39a   :  { %s1012_s17 = scalar_lea.hbm %s1337_s6, 256 }
 0x39b   :  { %p1013_p11 = scmp.ne.s32.totalorder %s1337_s6, %s1012_s17  ;;  %p1016_p12 = scmp.lt.u32.totalorder %s1012_s17, %s1337_s6 }
 0x39d   :  { %p1018_p13 = pnand %p1016_p12, %p1013_p11 }
 0x39f   :  { %1021 = shalt.err (!%p1018_p13)
}
 0x3a0   :  { %689 = dma.vmem_to_hbm [thread:$0]  %s684_s15, 256, %s1337_s6, [#allocation4], %s1039_s0, %s1039_s0, %s1040_s20  }
 0x3a1   :  { %1028 = dma.done.wait [#allocation4], 256  }
 0x3a2   :  { %1029 = vsyncadd [#allocation4], 4294967040 }
 0x3a3   :  { %1030 = dma.done.wait [#allocation12], 1024  }
 0x3a4   :  { %1031 = vsyncadd [#allocation12], 4294966272 }
 0x3a5   :  { %723 = vsyncpa [#allocation3], 1 }
 0x3a6   :  { %724 = vsyncpa [#allocation6], 1 }
 0x3a7   :  { %725 = vsyncpa [#allocation9], 1 }
 0x3a8   :  { %726 = vsyncpa [#allocation4], 1 }
 0x3a9   :  { %727 = vsyncpa [#allocation12], 1 }

</bundles_post_ra>
